<compile_context>
chip_gen: v7x
topology: tpu7x:2x2x1
jax: 0.10.0
libtpu: 0.0.40
codegen_flags: <defaults>
</compile_context>

<pallas_src>
import jax
import jax.numpy as jnp
from jax.experimental import pallas as pl
from jax.experimental.pallas import tpu as pltpu

EMBEDDING_DIM = 32
LSTM_HIDDEN = 32
SEQ_LEN = 3  # [prev_best, global_best, current]


def _make_controller_kernel(offsets, n_params):
    """Build the fused embedding-gather + LSTM + FC kernel.

    offsets : static (python) row offsets of each param's embedding table
              inside the stacked `emb_all` table.
    """
    H = LSTM_HIDDEN
    E = EMBEDDING_DIM

    def kernel(idx_ref,      # SMEM (SEQ_LEN, n_params) int32  lookup indices
               emb_ref,      # VMEM (total_choices, E)  f32    stacked embedding tables
               wih_ref,      # VMEM (n_params*E, 4H)    f32    W_ih^T (gate order i,f,g,o)
               whh_ref,      # VMEM (H, 4H)             f32    W_hh^T
               b_ref,        # VMEM (1, 4H)             f32    b_ih + b_hh
               fcw_ref,      # VMEM (1, H)              f32    fc.weight
               fcb_ref,      # VMEM (1, 1)              f32    fc.bias
               out_ref,      # VMEM (1, 1)              f32    predicted reward
               xp_scr):      # VMEM (n_params, SEQ_LEN, E) f32 gather staging buffer
        # -------------------------------------------------------------------
        # Embedding gather + input projection (hoisted out of the recurrence):
        #   xw = concat_p(emb_p[idx]) @ W_ih^T
        #      = sum_p  emb_rows_p (3, E) @ W_ih^T[p*E:(p+1)*E, :]
        # One M=3 matmul per parameter; no lane-dim concatenation needed.
        # -------------------------------------------------------------------
        xw = jnp.zeros((SEQ_LEN, 4 * H), jnp.float32)
        for p in range(n_params):                       # static unroll
            for t in range(SEQ_LEN):                    # static unroll
                r = idx_ref[t, p] + offsets[p]          # dynamic row in stacked table
                xp_scr[p, pl.ds(t, 1), :] = emb_ref[pl.ds(r, 1), :]
            xw = xw + jnp.dot(xp_scr[p], wih_ref[pl.ds(p * E, E), :],
                              preferred_element_type=jnp.float32)

        # Fused gate nonlinearity: tanh on the g-gate lanes [2H, 3H),
        # sigmoid elsewhere, computed in a single full-vreg pass.
        lane = jax.lax.broadcasted_iota(jnp.int32, (1, 4 * H), 1)
        is_g_lane = jnp.logical_and(lane >= 2 * H, lane < 3 * H)

        # Recurrence: h / c live in vector registers (no VMEM scratch).
        h = jnp.zeros((1, H), jnp.float32)
        c = jnp.zeros((1, H), jnp.float32)
        for t in range(SEQ_LEN):                        # static unroll, T = 3
            gates = (xw[t:t + 1, :]
                     + jnp.dot(h, whh_ref[...], preferred_element_type=jnp.float32)
                     + b_ref[...])                      # (1, 4H)
            act = jnp.where(is_g_lane, jnp.tanh(gates), jax.nn.sigmoid(gates))
            i_g = act[:, 0 * H:1 * H]
            f_g = act[:, 1 * H:2 * H]
            g_g = act[:, 2 * H:3 * H]
            o_g = act[:, 3 * H:4 * H]
            c = f_g * c + i_g * g_g
            h = o_g * jnp.tanh(c)

        # fc(h_n[-1]):  (1,H)·(H,1) == sum(h * w) + b  -> (1,1)
        out_ref[...] = jnp.sum(h * fcw_ref[...], keepdims=True) + fcb_ref[...]

    return kernel


def make_controller_forward(search_space):
    """Returns a jit'd forward(params, prev_best, global_best, current) -> scalar."""
    n_params = len(search_space)
    offsets, off = [], 0
    for choices in search_space.values():
        offsets.append(off)
        off += len(choices)
    offsets = tuple(offsets)

    kernel = _make_controller_kernel(offsets, n_params)
    vmem = pl.BlockSpec(memory_space=pltpu.MemorySpace.VMEM)
    smem = pl.BlockSpec(memory_space=pltpu.MemorySpace.SMEM)

    call = pl.pallas_call(
        kernel,
        out_shape=jax.ShapeDtypeStruct((1, 1), jnp.float32),
        in_specs=[smem, vmem, vmem, vmem, vmem, vmem, vmem],
        out_specs=vmem,
        scratch_shapes=[pltpu.VMEM((n_params, SEQ_LEN, EMBEDDING_DIM), jnp.float32)],
    )

    @jax.jit
    def forward(params, prev_best, global_best, current):
        idx = jnp.stack([prev_best, global_best, current], axis=0).astype(jnp.int32)
        out = call(idx, params["emb_all"], params["w_ih_t"], params["w_hh_t"],
                   params["bias"], params["fc_w"], params["fc_b"])
        return out[0, 0]                                # .squeeze()

    return forward


# ----------------------------------------------------------------------------
# Parameter construction (kernel layout) + pure-JAX reference
# ----------------------------------------------------------------------------

def init_controller_params(key, search_space):
    """Deterministic synthetic init matching the PyTorch module's shapes.

    Weights are stored directly in kernel layout (pre-transposed W, pre-summed
    bias, (1,1) fc bias) so the forward path does no per-call transposes/reshapes.
    """
    names = list(search_space.keys())
    n_params = len(names)
    input_size = EMBEDDING_DIM * n_params
    H = LSTM_HIDDEN
    keys = jax.random.split(key, n_params + 6)

    emb_tables = {}
    for i, name in enumerate(names):
        n_choices = len(search_space[name])
        emb_tables[name] = jax.random.normal(
            keys[i], (n_choices, EMBEDDING_DIM), dtype=jnp.float32)

    s = 1.0 / float(H) ** 0.5
    w_ih = jax.random.uniform(keys[n_params + 0], (4 * H, input_size),
                              minval=-s, maxval=s, dtype=jnp.float32)
    w_hh = jax.random.uniform(keys[n_params + 1], (4 * H, H),
                              minval=-s, maxval=s, dtype=jnp.float32)
    b_ih = jax.random.uniform(keys[n_params + 2], (4 * H,),
                              minval=-s, maxval=s, dtype=jnp.float32)
    b_hh = jax.random.uniform(keys[n_params + 3], (4 * H,),
                              minval=-s, maxval=s, dtype=jnp.float32)
    fc_w = jax.random.uniform(keys[n_params + 4], (1, H),
                              minval=-s, maxval=s, dtype=jnp.float32)
    fc_b = jax.random.uniform(keys[n_params + 5], (1,),
                              minval=-s, maxval=s, dtype=jnp.float32)

    params = {
        "emb_all": jnp.concatenate([emb_tables[n] for n in names], axis=0),
        "w_ih_t": w_ih.T,                               # (input_size, 4H)
        "w_hh_t": w_hh.T,                               # (H, 4H)
        "bias": (b_ih + b_hh).reshape(1, 4 * H),        # (1, 4H)
        "fc_w": fc_w,                                   # (1, H)
        "fc_b": fc_b.reshape(1, 1),                     # (1, 1)
    }
    return params, emb_tables


def controller_forward_ref(params, emb_tables, state_keys,
                           prev_best, global_best, current):
    """Pure-JAX reference matching the PyTorch Controller.forward."""
    def embed(indices):
        parts = [emb_tables[k][indices[i]] for i, k in enumerate(state_keys)]
        return jnp.concatenate(parts, axis=-1)

    x = jnp.stack([embed(prev_best), embed(global_best), embed(current)], axis=0)
    H = LSTM_HIDDEN
    h = jnp.zeros((H,), jnp.float32)
    c = jnp.zeros((H,), jnp.float32)
    for t in range(SEQ_LEN):
        gates = x[t] @ params["w_ih_t"] + h @ params["w_hh_t"] + params["bias"][0]
        i_g = jax.nn.sigmoid(gates[0 * H:1 * H])
        f_g = jax.nn.sigmoid(gates[1 * H:2 * H])
        g_g = jnp.tanh(gates[2 * H:3 * H])
        o_g = jax.nn.sigmoid(gates[3 * H:4 * H])
        c = f_g * c + i_g * g_g
        h = o_g * jnp.tanh(c)
    return params["fc_w"][0] @ h + params["fc_b"][0, 0]


if __name__ == "__main__":
    # Small synthetic search space: 4 params -> input_size = 4 * 32 = 128.
    search_space = {
        "kernel": [3, 5, 7],
        "width": [32, 64, 128, 256],
        "depth": [1, 2, 3, 4, 5],
        "act": ["relu", "gelu"],
    }
    state_keys = list(search_space.keys())

    params, emb_tables = init_controller_params(jax.random.PRNGKey(0), search_space)
    forward = make_controller_forward(search_space)

    prev_best = jnp.array([0, 1, 2, 0], dtype=jnp.int32)
    global_best = jnp.array([2, 3, 4, 1], dtype=jnp.int32)
    current = jnp.array([1, 0, 3, 1], dtype=jnp.int32)

    reward = forward(params, prev_best, global_best, current)
    reward = jax.block_until_ready(reward)

    ref = controller_forward_ref(params, emb_tables, state_keys,
                                 prev_best, global_best, current)
    assert jnp.allclose(reward, ref, rtol=1e-3, atol=1e-4), (reward, ref)

    print("KERNEL_OK")
</pallas_src>

<mosaic_0001>
module attributes {stable_mosaic.version = 11 : i64} {
  func.func @kernel(%arg0: memref<3x4xi32, #tpu.memory_space<smem>>, %arg1: memref<14x32xf32, #tpu.memory_space<vmem>>, %arg2: memref<128x128xf32, #tpu.memory_space<vmem>>, %arg3: memref<32x128xf32, #tpu.memory_space<vmem>>, %arg4: memref<1x128xf32, #tpu.memory_space<vmem>>, %arg5: memref<1x32xf32, #tpu.memory_space<vmem>>, %arg6: memref<1x1xf32, #tpu.memory_space<vmem>>, %arg7: memref<1x1xf32, #tpu.memory_space<vmem>>, %arg8: memref<4x3x32xf32, #tpu.memory_space<vmem>>) attributes {dimension_semantics = [], scalar_prefetch = 0 : i64, scratch_operands = 1 : i64, tpu.core_type = #tpu.core_type<tc>} {
    %cst = arith.constant 0.000000e+00 : f32
    %0 = vector.broadcast %cst : f32 to vector<3x128xf32>
    %c0 = arith.constant 0 : index
    %c0_0 = arith.constant 0 : index
    %1 = memref.load %arg0[%c0, %c0_0] : memref<3x4xi32, #tpu.memory_space<smem>>
    %c0_i32 = arith.constant 0 : i32
    %2 = arith.addi %1, %c0_i32 : i32
    %3 = arith.index_cast %2 : i32 to index
    %c0_1 = arith.constant 0 : index
    %4 = vector.load %arg1[%3, %c0_1] : memref<14x32xf32, #tpu.memory_space<vmem>>, vector<1x32xf32>
    %c0_2 = arith.constant 0 : index
    %c0_3 = arith.constant 0 : index
    %c0_4 = arith.constant 0 : index
    %5 = vector.load %arg8[%c0_2, %c0_3, %c0_4] : memref<4x3x32xf32, #tpu.memory_space<vmem>>, vector<1x1x32xf32>
    %6 = vector.shape_cast %5 : vector<1x1x32xf32> to vector<1x32xf32>
    %7 = vector.shape_cast %4 : vector<1x32xf32> to vector<1x1x32xf32>
    tpu.vector_store %arg8[%c0_2, %c0_3, %c0_4], %7 {strides = array<i32>} : memref<4x3x32xf32, #tpu.memory_space<vmem>>, vector<1x1x32xf32>,
    %c1 = arith.constant 1 : index
    %c0_5 = arith.constant 0 : index
    %8 = memref.load %arg0[%c1, %c0_5] : memref<3x4xi32, #tpu.memory_space<smem>>
    %c0_i32_6 = arith.constant 0 : i32
    %9 = arith.addi %8, %c0_i32_6 : i32
    %10 = arith.index_cast %9 : i32 to index
    %c0_7 = arith.constant 0 : index
    %11 = vector.load %arg1[%10, %c0_7] : memref<14x32xf32, #tpu.memory_space<vmem>>, vector<1x32xf32>
    %c0_8 = arith.constant 0 : index
    %c1_9 = arith.constant 1 : index
    %c0_10 = arith.constant 0 : index
    %12 = vector.load %arg8[%c0_8, %c1_9, %c0_10] : memref<4x3x32xf32, #tpu.memory_space<vmem>>, vector<1x1x32xf32>
    %13 = vector.shape_cast %12 : vector<1x1x32xf32> to vector<1x32xf32>
    %14 = vector.shape_cast %11 : vector<1x32xf32> to vector<1x1x32xf32>
    tpu.vector_store %arg8[%c0_8, %c1_9, %c0_10], %14 {strides = array<i32>} : memref<4x3x32xf32, #tpu.memory_space<vmem>>, vector<1x1x32xf32>,
    %c2 = arith.constant 2 : index
    %c0_11 = arith.constant 0 : index
    %15 = memref.load %arg0[%c2, %c0_11] : memref<3x4xi32, #tpu.memory_space<smem>>
    %c0_i32_12 = arith.constant 0 : i32
    %16 = arith.addi %15, %c0_i32_12 : i32
    %17 = arith.index_cast %16 : i32 to index
    %c0_13 = arith.constant 0 : index
    %18 = vector.load %arg1[%17, %c0_13] : memref<14x32xf32, #tpu.memory_space<vmem>>, vector<1x32xf32>
    %c0_14 = arith.constant 0 : index
    %c2_15 = arith.constant 2 : index
    %c0_16 = arith.constant 0 : index
    %19 = vector.load %arg8[%c0_14, %c2_15, %c0_16] : memref<4x3x32xf32, #tpu.memory_space<vmem>>, vector<1x1x32xf32>
    %20 = vector.shape_cast %19 : vector<1x1x32xf32> to vector<1x32xf32>
    %21 = vector.shape_cast %18 : vector<1x32xf32> to vector<1x1x32xf32>
    tpu.vector_store %arg8[%c0_14, %c2_15, %c0_16], %21 {strides = array<i32>} : memref<4x3x32xf32, #tpu.memory_space<vmem>>, vector<1x1x32xf32>,
    %c0_17 = arith.constant 0 : index
    %c0_18 = arith.constant 0 : index
    %c0_19 = arith.constant 0 : index
    %22 = vector.load %arg8[%c0_17, %c0_18, %c0_19] : memref<4x3x32xf32, #tpu.memory_space<vmem>>, vector<1x3x32xf32>
    %23 = vector.shape_cast %22 : vector<1x3x32xf32> to vector<3x32xf32>
    %c0_20 = arith.constant 0 : index
    %c0_21 = arith.constant 0 : index
    %24 = vector.load %arg2[%c0_20, %c0_21] : memref<128x128xf32, #tpu.memory_space<vmem>>, vector<32x128xf32>
    %cst_22 = arith.constant dense<0.000000e+00> : vector<3x128xf32>
    %25 = tpu.matmul %23, %24, %cst_22 {dimension_numbers = #tpu.dot_dimension_numbers<[1], [0], [0], [1], [0, 0, 1, 1], [], []>} : vector<3x32xf32>, vector<32x128xf32>, vector<3x128xf32> -> vector<3x128xf32>
    %26 = arith.addf %0, %25 : vector<3x128xf32>
    %c0_23 = arith.constant 0 : index
    %c1_24 = arith.constant 1 : index
    %27 = memref.load %arg0[%c0_23, %c1_24] : memref<3x4xi32, #tpu.memory_space<smem>>
    %c3_i32 = arith.constant 3 : i32
    %28 = arith.addi %27, %c3_i32 : i32
    %29 = arith.index_cast %28 : i32 to index
    %c0_25 = arith.constant 0 : index
    %30 = vector.load %arg1[%29, %c0_25] : memref<14x32xf32, #tpu.memory_space<vmem>>, vector<1x32xf32>
    %c1_26 = arith.constant 1 : index
    %c0_27 = arith.constant 0 : index
    %c0_28 = arith.constant 0 : index
    %31 = vector.load %arg8[%c1_26, %c0_27, %c0_28] : memref<4x3x32xf32, #tpu.memory_space<vmem>>, vector<1x1x32xf32>
    %32 = vector.shape_cast %31 : vector<1x1x32xf32> to vector<1x32xf32>
    %33 = vector.shape_cast %30 : vector<1x32xf32> to vector<1x1x32xf32>
    tpu.vector_store %arg8[%c1_26, %c0_27, %c0_28], %33 {strides = array<i32>} : memref<4x3x32xf32, #tpu.memory_space<vmem>>, vector<1x1x32xf32>,
    %c1_29 = arith.constant 1 : index
    %c1_30 = arith.constant 1 : index
    %34 = memref.load %arg0[%c1_29, %c1_30] : memref<3x4xi32, #tpu.memory_space<smem>>
    %c3_i32_31 = arith.constant 3 : i32
    %35 = arith.addi %34, %c3_i32_31 : i32
    %36 = arith.index_cast %35 : i32 to index
    %c0_32 = arith.constant 0 : index
    %37 = vector.load %arg1[%36, %c0_32] : memref<14x32xf32, #tpu.memory_space<vmem>>, vector<1x32xf32>
    %c1_33 = arith.constant 1 : index
    %c1_34 = arith.constant 1 : index
    %c0_35 = arith.constant 0 : index
    %38 = vector.load %arg8[%c1_33, %c1_34, %c0_35] : memref<4x3x32xf32, #tpu.memory_space<vmem>>, vector<1x1x32xf32>
    %39 = vector.shape_cast %38 : vector<1x1x32xf32> to vector<1x32xf32>
    %40 = vector.shape_cast %37 : vector<1x32xf32> to vector<1x1x32xf32>
    tpu.vector_store %arg8[%c1_33, %c1_34, %c0_35], %40 {strides = array<i32>} : memref<4x3x32xf32, #tpu.memory_space<vmem>>, vector<1x1x32xf32>,
    %c2_36 = arith.constant 2 : index
    %c1_37 = arith.constant 1 : index
    %41 = memref.load %arg0[%c2_36, %c1_37] : memref<3x4xi32, #tpu.memory_space<smem>>
    %c3_i32_38 = arith.constant 3 : i32
    %42 = arith.addi %41, %c3_i32_38 : i32
    %43 = arith.index_cast %42 : i32 to index
    %c0_39 = arith.constant 0 : index
    %44 = vector.load %arg1[%43, %c0_39] : memref<14x32xf32, #tpu.memory_space<vmem>>, vector<1x32xf32>
    %c1_40 = arith.constant 1 : index
    %c2_41 = arith.constant 2 : index
    %c0_42 = arith.constant 0 : index
    %45 = vector.load %arg8[%c1_40, %c2_41, %c0_42] : memref<4x3x32xf32, #tpu.memory_space<vmem>>, vector<1x1x32xf32>
    %46 = vector.shape_cast %45 : vector<1x1x32xf32> to vector<1x32xf32>
    %47 = vector.shape_cast %44 : vector<1x32xf32> to vector<1x1x32xf32>
    tpu.vector_store %arg8[%c1_40, %c2_41, %c0_42], %47 {strides = array<i32>} : memref<4x3x32xf32, #tpu.memory_space<vmem>>, vector<1x1x32xf32>,
    %c1_43 = arith.constant 1 : index
    %c0_44 = arith.constant 0 : index
    %c0_45 = arith.constant 0 : index
    %48 = vector.load %arg8[%c1_43, %c0_44, %c0_45] : memref<4x3x32xf32, #tpu.memory_space<vmem>>, vector<1x3x32xf32>
    %49 = vector.shape_cast %48 : vector<1x3x32xf32> to vector<3x32xf32>
    %c32 = arith.constant 32 : index
    %c0_46 = arith.constant 0 : index
    %50 = vector.load %arg2[%c32, %c0_46] : memref<128x128xf32, #tpu.memory_space<vmem>>, vector<32x128xf32>
    %cst_47 = arith.constant dense<0.000000e+00> : vector<3x128xf32>
    %51 = tpu.matmul %49, %50, %cst_47 {dimension_numbers = #tpu.dot_dimension_numbers<[1], [0], [0], [1], [0, 0, 1, 1], [], []>} : vector<3x32xf32>, vector<32x128xf32>, vector<3x128xf32> -> vector<3x128xf32>
    %52 = arith.addf %26, %51 : vector<3x128xf32>
    %c0_48 = arith.constant 0 : index
    %c2_49 = arith.constant 2 : index
    %53 = memref.load %arg0[%c0_48, %c2_49] : memref<3x4xi32, #tpu.memory_space<smem>>
    %c7_i32 = arith.constant 7 : i32
    %54 = arith.addi %53, %c7_i32 : i32
    %55 = arith.index_cast %54 : i32 to index
    %c0_50 = arith.constant 0 : index
    %56 = vector.load %arg1[%55, %c0_50] : memref<14x32xf32, #tpu.memory_space<vmem>>, vector<1x32xf32>
    %c2_51 = arith.constant 2 : index
    %c0_52 = arith.constant 0 : index
    %c0_53 = arith.constant 0 : index
    %57 = vector.load %arg8[%c2_51, %c0_52, %c0_53] : memref<4x3x32xf32, #tpu.memory_space<vmem>>, vector<1x1x32xf32>
    %58 = vector.shape_cast %57 : vector<1x1x32xf32> to vector<1x32xf32>
    %59 = vector.shape_cast %56 : vector<1x32xf32> to vector<1x1x32xf32>
    tpu.vector_store %arg8[%c2_51, %c0_52, %c0_53], %59 {strides = array<i32>} : memref<4x3x32xf32, #tpu.memory_space<vmem>>, vector<1x1x32xf32>,
    %c1_54 = arith.constant 1 : index
    %c2_55 = arith.constant 2 : index
    %60 = memref.load %arg0[%c1_54, %c2_55] : memref<3x4xi32, #tpu.memory_space<smem>>
    %c7_i32_56 = arith.constant 7 : i32
    %61 = arith.addi %60, %c7_i32_56 : i32
    %62 = arith.index_cast %61 : i32 to index
    %c0_57 = arith.constant 0 : index
    %63 = vector.load %arg1[%62, %c0_57] : memref<14x32xf32, #tpu.memory_space<vmem>>, vector<1x32xf32>
    %c2_58 = arith.constant 2 : index
    %c1_59 = arith.constant 1 : index
    %c0_60 = arith.constant 0 : index
    %64 = vector.load %arg8[%c2_58, %c1_59, %c0_60] : memref<4x3x32xf32, #tpu.memory_space<vmem>>, vector<1x1x32xf32>
    %65 = vector.shape_cast %64 : vector<1x1x32xf32> to vector<1x32xf32>
    %66 = vector.shape_cast %63 : vector<1x32xf32> to vector<1x1x32xf32>
    tpu.vector_store %arg8[%c2_58, %c1_59, %c0_60], %66 {strides = array<i32>} : memref<4x3x32xf32, #tpu.memory_space<vmem>>, vector<1x1x32xf32>,
    %c2_61 = arith.constant 2 : index
    %c2_62 = arith.constant 2 : index
    %67 = memref.load %arg0[%c2_61, %c2_62] : memref<3x4xi32, #tpu.memory_space<smem>>
    %c7_i32_63 = arith.constant 7 : i32
    %68 = arith.addi %67, %c7_i32_63 : i32
    %69 = arith.index_cast %68 : i32 to index
    %c0_64 = arith.constant 0 : index
    %70 = vector.load %arg1[%69, %c0_64] : memref<14x32xf32, #tpu.memory_space<vmem>>, vector<1x32xf32>
    %c2_65 = arith.constant 2 : index
    %c2_66 = arith.constant 2 : index
    %c0_67 = arith.constant 0 : index
    %71 = vector.load %arg8[%c2_65, %c2_66, %c0_67] : memref<4x3x32xf32, #tpu.memory_space<vmem>>, vector<1x1x32xf32>
    %72 = vector.shape_cast %71 : vector<1x1x32xf32> to vector<1x32xf32>
    %73 = vector.shape_cast %70 : vector<1x32xf32> to vector<1x1x32xf32>
    tpu.vector_store %arg8[%c2_65, %c2_66, %c0_67], %73 {strides = array<i32>} : memref<4x3x32xf32, #tpu.memory_space<vmem>>, vector<1x1x32xf32>,
    %c2_68 = arith.constant 2 : index
    %c0_69 = arith.constant 0 : index
    %c0_70 = arith.constant 0 : index
    %74 = vector.load %arg8[%c2_68, %c0_69, %c0_70] : memref<4x3x32xf32, #tpu.memory_space<vmem>>, vector<1x3x32xf32>
    %75 = vector.shape_cast %74 : vector<1x3x32xf32> to vector<3x32xf32>
    %c64 = arith.constant 64 : index
    %c0_71 = arith.constant 0 : index
    %76 = vector.load %arg2[%c64, %c0_71] : memref<128x128xf32, #tpu.memory_space<vmem>>, vector<32x128xf32>
    %cst_72 = arith.constant dense<0.000000e+00> : vector<3x128xf32>
    %77 = tpu.matmul %75, %76, %cst_72 {dimension_numbers = #tpu.dot_dimension_numbers<[1], [0], [0], [1], [0, 0, 1, 1], [], []>} : vector<3x32xf32>, vector<32x128xf32>, vector<3x128xf32> -> vector<3x128xf32>
    %78 = arith.addf %52, %77 : vector<3x128xf32>
    %c0_73 = arith.constant 0 : index
    %c3 = arith.constant 3 : index
    %79 = memref.load %arg0[%c0_73, %c3] : memref<3x4xi32, #tpu.memory_space<smem>>
    %c12_i32 = arith.constant 12 : i32
    %80 = arith.addi %79, %c12_i32 : i32
    %81 = arith.index_cast %80 : i32 to index
    %c0_74 = arith.constant 0 : index
    %82 = vector.load %arg1[%81, %c0_74] : memref<14x32xf32, #tpu.memory_space<vmem>>, vector<1x32xf32>
    %c3_75 = arith.constant 3 : index
    %c0_76 = arith.constant 0 : index
    %c0_77 = arith.constant 0 : index
    %83 = vector.load %arg8[%c3_75, %c0_76, %c0_77] : memref<4x3x32xf32, #tpu.memory_space<vmem>>, vector<1x1x32xf32>
    %84 = vector.shape_cast %83 : vector<1x1x32xf32> to vector<1x32xf32>
    %85 = vector.shape_cast %82 : vector<1x32xf32> to vector<1x1x32xf32>
    tpu.vector_store %arg8[%c3_75, %c0_76, %c0_77], %85 {strides = array<i32>} : memref<4x3x32xf32, #tpu.memory_space<vmem>>, vector<1x1x32xf32>,
    %c1_78 = arith.constant 1 : index
    %c3_79 = arith.constant 3 : index
    %86 = memref.load %arg0[%c1_78, %c3_79] : memref<3x4xi32, #tpu.memory_space<smem>>
    %c12_i32_80 = arith.constant 12 : i32
    %87 = arith.addi %86, %c12_i32_80 : i32
    %88 = arith.index_cast %87 : i32 to index
    %c0_81 = arith.constant 0 : index
    %89 = vector.load %arg1[%88, %c0_81] : memref<14x32xf32, #tpu.memory_space<vmem>>, vector<1x32xf32>
    %c3_82 = arith.constant 3 : index
    %c1_83 = arith.constant 1 : index
    %c0_84 = arith.constant 0 : index
    %90 = vector.load %arg8[%c3_82, %c1_83, %c0_84] : memref<4x3x32xf32, #tpu.memory_space<vmem>>, vector<1x1x32xf32>
    %91 = vector.shape_cast %90 : vector<1x1x32xf32> to vector<1x32xf32>
    %92 = vector.shape_cast %89 : vector<1x32xf32> to vector<1x1x32xf32>
    tpu.vector_store %arg8[%c3_82, %c1_83, %c0_84], %92 {strides = array<i32>} : memref<4x3x32xf32, #tpu.memory_space<vmem>>, vector<1x1x32xf32>,
    %c2_85 = arith.constant 2 : index
    %c3_86 = arith.constant 3 : index
    %93 = memref.load %arg0[%c2_85, %c3_86] : memref<3x4xi32, #tpu.memory_space<smem>>
    %c12_i32_87 = arith.constant 12 : i32
    %94 = arith.addi %93, %c12_i32_87 : i32
    %95 = arith.index_cast %94 : i32 to index
    %c0_88 = arith.constant 0 : index
    %96 = vector.load %arg1[%95, %c0_88] : memref<14x32xf32, #tpu.memory_space<vmem>>, vector<1x32xf32>
    %c3_89 = arith.constant 3 : index
    %c2_90 = arith.constant 2 : index
    %c0_91 = arith.constant 0 : index
    %97 = vector.load %arg8[%c3_89, %c2_90, %c0_91] : memref<4x3x32xf32, #tpu.memory_space<vmem>>, vector<1x1x32xf32>
    %98 = vector.shape_cast %97 : vector<1x1x32xf32> to vector<1x32xf32>
    %99 = vector.shape_cast %96 : vector<1x32xf32> to vector<1x1x32xf32>
    tpu.vector_store %arg8[%c3_89, %c2_90, %c0_91], %99 {strides = array<i32>} : memref<4x3x32xf32, #tpu.memory_space<vmem>>, vector<1x1x32xf32>,
    %c3_92 = arith.constant 3 : index
    %c0_93 = arith.constant 0 : index
    %c0_94 = arith.constant 0 : index
    %100 = vector.load %arg8[%c3_92, %c0_93, %c0_94] : memref<4x3x32xf32, #tpu.memory_space<vmem>>, vector<1x3x32xf32>
    %101 = vector.shape_cast %100 : vector<1x3x32xf32> to vector<3x32xf32>
    %c96 = arith.constant 96 : index
    %c0_95 = arith.constant 0 : index
    %102 = vector.load %arg2[%c96, %c0_95] : memref<128x128xf32, #tpu.memory_space<vmem>>, vector<32x128xf32>
    %cst_96 = arith.constant dense<0.000000e+00> : vector<3x128xf32>
    %103 = tpu.matmul %101, %102, %cst_96 {dimension_numbers = #tpu.dot_dimension_numbers<[1], [0], [0], [1], [0, 0, 1, 1], [], []>} : vector<3x32xf32>, vector<32x128xf32>, vector<3x128xf32> -> vector<3x128xf32>
    %104 = arith.addf %78, %103 : vector<3x128xf32>
    %105 = tpu.iota {dimensions = array<i32: 1>} : vector<1x128xi32>
    %c64_i32 = arith.constant 64 : i32
    %106 = vector.broadcast %c64_i32 : i32 to vector<1x128xi32>
    %107 = arith.cmpi sge, %105, %106 : vector<1x128xi32>
    %c96_i32 = arith.constant 96 : i32
    %108 = vector.broadcast %c96_i32 : i32 to vector<1x128xi32>
    %109 = arith.cmpi slt, %105, %108 : vector<1x128xi32>
    %110 = arith.andi %107, %109 : vector<1x128xi1>
    %cst_97 = arith.constant 0.000000e+00 : f32
    %111 = vector.broadcast %cst_97 : f32 to vector<1x32xf32>
    %cst_98 = arith.constant 0.000000e+00 : f32
    %112 = vector.broadcast %cst_98 : f32 to vector<1x32xf32>
    %113 = vector.extract_strided_slice %104 {offsets = [0, 0], sizes = [1, 128], strides = [1, 1]} : vector<3x128xf32> to vector<1x128xf32>
    %c0_99 = arith.constant 0 : index
    %c0_100 = arith.constant 0 : index
    %114 = vector.load %arg3[%c0_99, %c0_100] : memref<32x128xf32, #tpu.memory_space<vmem>>, vector<32x128xf32>
    %cst_101 = arith.constant dense<0.000000e+00> : vector<1x128xf32>
    %115 = tpu.matmul %111, %114, %cst_101 {dimension_numbers = #tpu.dot_dimension_numbers<[1], [0], [0], [1], [0, 0, 1, 1], [], []>} : vector<1x32xf32>, vector<32x128xf32>, vector<1x128xf32> -> vector<1x128xf32>
    %116 = arith.addf %113, %115 : vector<1x128xf32>
    %c0_102 = arith.constant 0 : index
    %c0_103 = arith.constant 0 : index
    %117 = vector.load %arg4[%c0_102, %c0_103] : memref<1x128xf32, #tpu.memory_space<vmem>>, vector<1x128xf32>
    %118 = arith.addf %116, %117 : vector<1x128xf32>
    %119 = math.tanh %118 : vector<1x128xf32>
    %120 = arith.negf %118 : vector<1x128xf32>
    %121 = math.exp %120 : vector<1x128xf32>
    %cst_104 = arith.constant 1.000000e+00 : f32
    %122 = vector.broadcast %cst_104 : f32 to vector<1x128xf32>
    %123 = arith.addf %122, %121 : vector<1x128xf32>
    %124 = arith.divf %122, %123 : vector<1x128xf32>
    %125 = arith.select %110, %119, %124 : vector<1x128xi1>, vector<1x128xf32>
    %126 = vector.extract_strided_slice %125 {offsets = [0, 0], sizes = [1, 32], strides = [1, 1]} : vector<1x128xf32> to vector<1x32xf32>
    %127 = vector.extract_strided_slice %125 {offsets = [0, 32], sizes = [1, 32], strides = [1, 1]} : vector<1x128xf32> to vector<1x32xf32>
    %128 = vector.extract_strided_slice %125 {offsets = [0, 64], sizes = [1, 32], strides = [1, 1]} : vector<1x128xf32> to vector<1x32xf32>
    %129 = vector.extract_strided_slice %125 {offsets = [0, 96], sizes = [1, 32], strides = [1, 1]} : vector<1x128xf32> to vector<1x32xf32>
    %130 = arith.mulf %127, %112 : vector<1x32xf32>
    %131 = arith.mulf %126, %128 : vector<1x32xf32>
    %132 = arith.addf %130, %131 : vector<1x32xf32>
    %133 = math.tanh %132 : vector<1x32xf32>
    %134 = arith.mulf %129, %133 : vector<1x32xf32>
    %135 = vector.extract_strided_slice %104 {offsets = [1, 0], sizes = [1, 128], strides = [1, 1]} : vector<3x128xf32> to vector<1x128xf32>
    %c0_105 = arith.constant 0 : index
    %c0_106 = arith.constant 0 : index
    %136 = vector.load %arg3[%c0_105, %c0_106] : memref<32x128xf32, #tpu.memory_space<vmem>>, vector<32x128xf32>
    %cst_107 = arith.constant dense<0.000000e+00> : vector<1x128xf32>
    %137 = tpu.matmul %134, %136, %cst_107 {dimension_numbers = #tpu.dot_dimension_numbers<[1], [0], [0], [1], [0, 0, 1, 1], [], []>} : vector<1x32xf32>, vector<32x128xf32>, vector<1x128xf32> -> vector<1x128xf32>
    %138 = arith.addf %135, %137 : vector<1x128xf32>
    %c0_108 = arith.constant 0 : index
    %c0_109 = arith.constant 0 : index
    %139 = vector.load %arg4[%c0_108, %c0_109] : memref<1x128xf32, #tpu.memory_space<vmem>>, vector<1x128xf32>
    %140 = arith.addf %138, %139 : vector<1x128xf32>
    %141 = math.tanh %140 : vector<1x128xf32>
    %142 = arith.negf %140 : vector<1x128xf32>
    %143 = math.exp %142 : vector<1x128xf32>
    %cst_110 = arith.constant 1.000000e+00 : f32
    %144 = vector.broadcast %cst_110 : f32 to vector<1x128xf32>
    %145 = arith.addf %144, %143 : vector<1x128xf32>
    %146 = arith.divf %144, %145 : vector<1x128xf32>
    %147 = arith.select %110, %141, %146 : vector<1x128xi1>, vector<1x128xf32>
    %148 = vector.extract_strided_slice %147 {offsets = [0, 0], sizes = [1, 32], strides = [1, 1]} : vector<1x128xf32> to vector<1x32xf32>
    %149 = vector.extract_strided_slice %147 {offsets = [0, 32], sizes = [1, 32], strides = [1, 1]} : vector<1x128xf32> to vector<1x32xf32>
    %150 = vector.extract_strided_slice %147 {offsets = [0, 64], sizes = [1, 32], strides = [1, 1]} : vector<1x128xf32> to vector<1x32xf32>
    %151 = vector.extract_strided_slice %147 {offsets = [0, 96], sizes = [1, 32], strides = [1, 1]} : vector<1x128xf32> to vector<1x32xf32>
    %152 = arith.mulf %149, %132 : vector<1x32xf32>
    %153 = arith.mulf %148, %150 : vector<1x32xf32>
    %154 = arith.addf %152, %153 : vector<1x32xf32>
    %155 = math.tanh %154 : vector<1x32xf32>
    %156 = arith.mulf %151, %155 : vector<1x32xf32>
    %157 = vector.extract_strided_slice %104 {offsets = [2, 0], sizes = [1, 128], strides = [1, 1]} : vector<3x128xf32> to vector<1x128xf32>
    %c0_111 = arith.constant 0 : index
    %c0_112 = arith.constant 0 : index
    %158 = vector.load %arg3[%c0_111, %c0_112] : memref<32x128xf32, #tpu.memory_space<vmem>>, vector<32x128xf32>
    %cst_113 = arith.constant dense<0.000000e+00> : vector<1x128xf32>
    %159 = tpu.matmul %156, %158, %cst_113 {dimension_numbers = #tpu.dot_dimension_numbers<[1], [0], [0], [1], [0, 0, 1, 1], [], []>} : vector<1x32xf32>, vector<32x128xf32>, vector<1x128xf32> -> vector<1x128xf32>
    %160 = arith.addf %157, %159 : vector<1x128xf32>
    %c0_114 = arith.constant 0 : index
    %c0_115 = arith.constant 0 : index
    %161 = vector.load %arg4[%c0_114, %c0_115] : memref<1x128xf32, #tpu.memory_space<vmem>>, vector<1x128xf32>
    %162 = arith.addf %160, %161 : vector<1x128xf32>
    %163 = math.tanh %162 : vector<1x128xf32>
    %164 = arith.negf %162 : vector<1x128xf32>
    %165 = math.exp %164 : vector<1x128xf32>
    %cst_116 = arith.constant 1.000000e+00 : f32
    %166 = vector.broadcast %cst_116 : f32 to vector<1x128xf32>
    %167 = arith.addf %166, %165 : vector<1x128xf32>
    %168 = arith.divf %166, %167 : vector<1x128xf32>
    %169 = arith.select %110, %163, %168 : vector<1x128xi1>, vector<1x128xf32>
    %170 = vector.extract_strided_slice %169 {offsets = [0, 0], sizes = [1, 32], strides = [1, 1]} : vector<1x128xf32> to vector<1x32xf32>
    %171 = vector.extract_strided_slice %169 {offsets = [0, 32], sizes = [1, 32], strides = [1, 1]} : vector<1x128xf32> to vector<1x32xf32>
    %172 = vector.extract_strided_slice %169 {offsets = [0, 64], sizes = [1, 32], strides = [1, 1]} : vector<1x128xf32> to vector<1x32xf32>
    %173 = vector.extract_strided_slice %169 {offsets = [0, 96], sizes = [1, 32], strides = [1, 1]} : vector<1x128xf32> to vector<1x32xf32>
    %174 = arith.mulf %171, %154 : vector<1x32xf32>
    %175 = arith.mulf %170, %172 : vector<1x32xf32>
    %176 = arith.addf %174, %175 : vector<1x32xf32>
    %177 = math.tanh %176 : vector<1x32xf32>
    %178 = arith.mulf %173, %177 : vector<1x32xf32>
    %c0_117 = arith.constant 0 : index
    %c0_118 = arith.constant 0 : index
    %179 = vector.load %arg5[%c0_117, %c0_118] : memref<1x32xf32, #tpu.memory_space<vmem>>, vector<1x32xf32>
    %180 = arith.mulf %178, %179 : vector<1x32xf32>
    %181 = vector.shape_cast %180 : vector<1x32xf32> to vector<1x1x32xf32>
    %cst_119 = arith.constant dense<0.000000e+00> : vector<1xf32>
    %182 = vector.multi_reduction <add>, %181, %cst_119 [1, 2] : vector<1x1x32xf32> to vector<1xf32>
    %183 = vector.shape_cast %182 : vector<1xf32> to vector<1x1x1xf32>
    %184 = vector.extract %183[0, 0, 0] : f32 from vector<1x1x1xf32>
    %185 = vector.broadcast %184 : f32 to vector<1x1xf32>
    %c0_120 = arith.constant 0 : index
    %c0_121 = arith.constant 0 : index
    %186 = vector.load %arg6[%c0_120, %c0_121] : memref<1x1xf32, #tpu.memory_space<vmem>>, vector<1x1xf32>
    %187 = arith.addf %185, %186 : vector<1x1xf32>
    %c0_122 = arith.constant 0 : index
    %c0_123 = arith.constant 0 : index
    %188 = vector.load %arg7[%c0_122, %c0_123] : memref<1x1xf32, #tpu.memory_space<vmem>>, vector<1x1xf32>
    tpu.vector_store %arg7[%c0_122, %c0_123], %187 {strides = array<i32>} : memref<1x1xf32, #tpu.memory_space<vmem>>, vector<1x1xf32>,
    return
  }
}

</mosaic_0001>

<bundles_post_ra>
// kernel: forward.1
= control target key start
LH: loop header
LB: loop body
LE: loop exit
PB: predicated region body
PF: predicated region fallthrough
CT: control target
= control target key end

     0   :  { %s1420_s0 = inlined_call_operand.vmem [shape: s32[3,4], index: 0, kind: input, shape index: {}]   ;;  %s1421_s1 = inlined_call_operand.hbm [shape: f32[14,32], index: 1, kind: input, shape index: {}]   ;;  %s1422_s2 = inlined_call_operand.hbm [shape: f32[128,128], index: 2, kind: input, shape index: {}]   ;;  %s1423_s3 = inlined_call_operand.vmem [shape: f32[32,128], index: 3, kind: input, shape index: {}]   ;;  %s1424_s4 = inlined_call_operand.vmem [shape: f32[1,128], index: 4, kind: input, shape index: {}]   ;;  %s1425_s5 = inlined_call_operand.hbm [shape: f32[1,32], index: 5, kind: input, shape index: {}]   ;;  %s1426_s6 = inlined_call_operand.<no memory space> [shape: f32[1,1], index: 6, kind: input, shape index: {}]   ;;  %s1427_s7 = inlined_call_operand.hbm [shape: f32[1,1], index: 7, kind: output, shape index: {}]  }
   0x1   :  { %v12_v0 = vstv %s1426_s6 }
   0x2   :  { %13 = vst [vmem:[#allocation3] sm:$0x1] %v12_v0 }
   0x3   :  { %14 = vsyncpa [#allocation7], 0 }
   0x4   :  { %15 = vsyncpa [#allocation5], 0 }
   0x5   :  { %16 = vsyncpa [#allocation10], 0 }
   0x6   :  { %17 = vsyncpa [#allocation6], 0  ;;  %s24_s28 = sshll.u32 %s1420_s0, 4  ;;  %s1195_s29 = smov [#allocation9]   ;;  %s25_s28 = int_to_ptr.vmem [resolvable:$true] %s24_s28 }
   0x7   :  { %s45_s30 = sshll.u32 %s1195_s29, 4  ;;  %s1087_s10 = scalar_lea.hbm %s1422_s2, 2048  ;;  %s46_s30 = int_to_ptr.vmem [resolvable:$true] %s45_s30 }
   0x8   :  { %p1088_p0 = scmp.ne.s32.totalorder %s1422_s2, %s1087_s10  ;;  %p1091_p1 = scmp.lt.u32.totalorder %s1087_s10, %s1422_s2 }
   0xa   :  { %p1093_p2 = pnand %p1091_p1, %p1088_p0 }
   0xc   :  { %1096 = shalt.err (!%p1093_p2)
}
   0xd   :  { %s1097_s14 = scalar_lea.vmem %s46_s30, 2048  ;;  %p1102_p4 = scmp.lt.s32.totalorder %s46_s30, %s46_s30 }
   0xe   :  { %p1098_p3 = scmp.ne.s32.totalorder %s46_s30, %s1097_s14  ;;  %p1103_p5 = scmp.lt.s32.totalorder %s1097_s14, %s1097_s14 }
  0x10   :  { %p1104_p6 = por %p1103_p5, %p1102_p4 }
  0x12   :  { %p1105_p7 = pnand %p1104_p6, %p1098_p3 }
  0x14   :  { %1108 = shalt.err (!%p1105_p7)
}
  0x15   :  { %s1196_s0 = smov 128   ;;  %s1197_s15 = smov 8  }
  0x16   :  { %51 = dma.hbm_to_vmem [thread:$0]  %s1422_s2, 2048, %s46_s30, [#allocation10], %s1196_s0, %s1196_s0, %s1197_s15  }
  0x17   :  { %s1109_s18 = scalar_lea.vmem %s25_s28, 64  ;;  %p1114_p9 = scmp.lt.s32.totalorder %s25_s28, %s25_s28 }
  0x18   :  { %p1110_p8 = scmp.ne.s32.totalorder %s25_s28, %s1109_s18  ;;  %p1115_p10 = scmp.lt.s32.totalorder %s1109_s18, %s1109_s18 }
  0x1a   :  { %p1116_p11 = por %p1115_p10, %p1114_p9 }
  0x1c   :  { %p1117_p12 = pnand %p1116_p11, %p1110_p8 }
  0x1e   :  { %1120 = shalt.err (!%p1117_p12)
}
  0x1f   :  { %s1198_s19 = smov [#allocation4]   ;;  %s1199_s20 = smov [#allocation8]  }
  0x20   :  { %27 = dma.vmem_to_smem %s25_s28, 64, %s1198_s19, [#allocation7]  }
  0x21   :  { %s33_s21 = sshll.u32 %s1199_s20, 4  ;;  %s1200_s22 = smov [#allocation11]   ;;  %s34_s21 = int_to_ptr.vmem [resolvable:$true] %s33_s21 }
  0x22   :  { %s62_s23 = sshll.u32 %s1200_s22, 4  ;;  %s1121_s26 = scalar_lea.hbm %s1421_s1, 256  ;;  %s63_s23 = int_to_ptr.vmem [resolvable:$true] %s62_s23 }
  0x23   :  { %p1122_p13 = scmp.ne.s32.totalorder %s1421_s1, %s1121_s26  ;;  %p1125_p0 = scmp.lt.u32.totalorder %s1121_s26, %s1421_s1 }
  0x25   :  { %p1127_p1 = pnand %p1125_p0, %p1122_p13 }
  0x27   :  { %1130 = shalt.err (!%p1127_p1)
}
  0x28   :  { %s1131_s28 = scalar_lea.vmem %s34_s21, 256  ;;  %p1136_p3 = scmp.lt.s32.totalorder %s34_s21, %s34_s21 }
  0x29   :  { %p1132_p2 = scmp.ne.s32.totalorder %s34_s21, %s1131_s28  ;;  %p1137_p4 = scmp.lt.s32.totalorder %s1131_s28, %s1131_s28 }
  0x2b   :  { %p1138_p5 = por %p1137_p4, %p1136_p3 }
  0x2d   :  { %p1139_p6 = pnand %p1138_p5, %p1132_p2 }
  0x2f   :  { %1142 = shalt.err (!%p1139_p6)
}
  0x30   :  { %39 = dma.hbm_to_vmem [thread:$0]  %s1421_s1, 256, %s34_s21, [#allocation5], %s1196_s0, %s1196_s0, %s1197_s15  }
  0x31   :  { %s1143_s12 = scalar_lea.hbm %s1425_s5, 16 }
  0x32   :  { %p1144_p7 = scmp.ne.s32.totalorder %s1425_s5, %s1143_s12  ;;  %p1147_p8 = scmp.lt.u32.totalorder %s1143_s12, %s1425_s5 }
  0x34   :  { %p1149_p9 = pnand %p1147_p8, %p1144_p7 }
  0x36   :  { %1152 = shalt.err (!%p1149_p9)
}
  0x37   :  { %s1153_s17 = scalar_lea.vmem %s63_s23, 16  ;;  %s1157_s18 = scalar_lea.vmem %s63_s23, 32 }
  0x38   :  { %p1154_p10 = scmp.ne.s32.totalorder %s63_s23, %s1153_s17  ;;  %p1158_p11 = scmp.lt.s32.totalorder %s63_s23, %s63_s23 }
  0x39   :  { %p1159_p12 = scmp.lt.s32.totalorder %s1157_s18, %s1153_s17 }
  0x3b   :  { %p1160_p13 = por %p1159_p12, %p1158_p11 }
  0x3d   :  { %p1161_p0 = pnand %p1160_p13, %p1154_p10 }
  0x3f   :  { %1164 = shalt.err (!%p1161_p0)
}
  0x40   :  { %65 = dma.hbm_to_vmem [thread:$0]  %s1425_s5, 16, %s63_s23, [#allocation10]  }
  0x41   :  { %1187 = dma.done.wait [#allocation7], 64  }
  0x42   :  { %1188 = vsyncadd [#allocation7], 4294967232 }
  0x43   :  { %1189 = dma.done.wait [#allocation5], 256  }
  0x44   :  { %1190 = vsyncadd [#allocation5], 4294967040 }
  0x45   :  { %1191 = dma.done.wait [#allocation10], 2064  }
  0x46   :  { %1192 = vsyncadd [#allocation10], 4294965232 }
  0x47   :  { %80 = sfence }
  0x48   :  { %v116_v1 = vld [vmem:[#allocation9 + $0x20] sm:$0xff]  ;;  %v117_v2 = vld [vmem:[#allocation9 + $0x28] sm:$0xff]  ;;  %v118_v3 = vld [vmem:[#allocation9 + $0x30] sm:$0xff]  ;;  %v1201_v4 = vmov 0.0|0.0   ;;  %vm1202_vm0 = vmmov 0   ;;  %v1203_v7 = vmov 0.0   ;;  %v457_v58 = vlaneseq }
  0x49   :  { %1000 = vmatprep.subr.bf16.mxu0 %v1201_v4  ;;  %v1001_v5 = vpack.c.bf16 %v117_v2, %v116_v1  ;;  %v119_v6 = vld [vmem:[#allocation9 + $0x38] sm:$0xff]  ;;  %931 = vmatprep.mubr.msk.f32.mxu0 %vm1202_vm0, %v1203_v7  ;;  %s860_s5 = sld [smem:[#allocation4 + $0x1]]  ;;  %s81_s20 = sld [smem:[#allocation4]]  ;;  %vm84_vm1 = vcmask 253952   ;;  %v463_v10 = vld [vmem:[%s1423_s3 + $0x8] sm:$0xff]  ;;  %v464_v12 = vld [vmem:[%s1423_s3 + $0x10] sm:$0xff] }
  0x4a   :  { %s862_s15 = sld [smem:[#allocation4 + $0x81]]  ;;  %1024 = vmatprep.subr.bf16.mxu1 %v1201_v4  ;;  %975 = vmatprep.mubr.msk.f32.mxu1 %vm1202_vm0, %v1203_v7  ;;  %v1004_v8 = vpack.c.bf16 %v119_v6, %v118_v3  ;;  %s858_s21 = sld [smem:[#allocation4 + $0x80]]  ;;  %v462_v9 = vld [vmem:[%s1423_s3] sm:$0xff]  ;;  %v465_v13 = vld [vmem:[%s1423_s3 + $0x18] sm:$0xff]  ;;  %v96_v22 = vld [vmem:[#allocation9 + $0x8] sm:$0xff]  ;;  %vm120_vm2 = vcmask 261120  }
  0x4b   :  { %s864_s19 = sld [smem:[#allocation4 + $0x101]]  ;;  %1002 = vmatpush3.bf16.msra.mxu0 %v1001_v5  ;;  %s1303_s22 = sld [smem:[#allocation4 + $0x100]]  ;;  %v1317_v11 = vpack.c.bf16 %v463_v10, %v462_v9  ;;  %v1329_v17 = vpack.c.bf16 %v465_v13, %v464_v12  ;;  %v95_v20 = vld [vmem:[#allocation9] sm:$0xff]  ;;  %v97_v27 = vld [vmem:[#allocation9 + $0x10] sm:$0xff]  ;;  %v98_v28 = vld [vmem:[#allocation9 + $0x18] sm:$0xff]  ;;  %v458_v60 = vand.u32 127, %v457_v58 }
  0x4c   :  { %1003 = vmatprep.subr.bf16.mxu0 %v1201_v4  ;;  %s1305_s23 = sld [smem:[#allocation4 + $0x2]]  ;;  %s875_s18 = sld [smem:[#allocation4 + $0x3]]  ;;  %v1007_v26 = vpack.c.bf16 %v96_v22, %v95_v20  ;;  %v1010_v30 = vpack.c.bf16 %v98_v28, %v97_v27  ;;  %v284_v31 = vld [vmem:[#allocation9 + $0x40] sm:$0xff]  ;;  %v285_v32 = vld [vmem:[#allocation9 + $0x48] sm:$0xff]  ;;  %v286_v38 = vld [vmem:[#allocation9 + $0x50] sm:$0xff]  ;;  %v648_v13 = vshrl.u32 %v457_v58, 7 }
  0x4d   :  { %s1307_s24 = sld [smem:[#allocation4 + $0x82]]  ;;  %1026 = vmatpush3.bf16.msra.mxu1 %v1317_v11  ;;  %s877_s1 = sld [smem:[#allocation4 + $0x83]]  ;;  %v1013_v37 = vpack.c.bf16 %v285_v32, %v284_v31  ;;  %v287_v39 = vld [vmem:[#allocation9 + $0x58] sm:$0xff]  ;;  %v379_v41 = vld [vmem:[#allocation9 + $0x60] sm:$0xff]  ;;  %v380_v42 = vld [vmem:[#allocation9 + $0x68] sm:$0xff]  ;;  %vm459_vm3 = vcmp.ge.s32.totalorder %v458_v60, 64 }
  0x4e   :  { %s1309_s25 = sld [smem:[#allocation4 + $0x102]]  ;;  %1027 = vmatprep.subr.bf16.mxu1 %v1201_v4  ;;  %s879_s0 = sld [smem:[#allocation4 + $0x103]]  ;;  %v1016_v40 = vpack.c.bf16 %v287_v39, %v286_v38  ;;  %v1019_v44 = vpack.c.bf16 %v380_v42, %v379_v41  ;;  %v381_v45 = vld [vmem:[#allocation9 + $0x70] sm:$0xff]  ;;  %v382_v46 = vld [vmem:[#allocation9 + $0x78] sm:$0xff]  ;;  %vm460_vm4 = vcmp.lt.s32.totalorder %v458_v60, 96  ;;  %vm818_vm6 = vcmask 0  }
  0x4f   :  { %1005 = vmatpush3.bf16.msra.mxu0 %v1004_v8  ;;  %s840_s10 = scalar_lea.vmem [#allocation8], %s860_s5  ;;  %s82_s3 = scalar_lea.vmem [#allocation8], %s81_s20  ;;  %v1022_v47 = vpack.c.bf16 %v382_v46, %v381_v45  ;;  %v540_v52 = vld [vmem:[%s1424_s4] sm:$0x1]  ;;  %vm1376_vm5 = vmand %vm459_vm3, %vm460_vm4 }
  0x50   :  { %1006 = vmatprep.subr.bf16.mxu0 %v1201_v4  ;;  %v861_v14 = vld [vmem:[%s840_s10 + $0x3] sm:$0x1]  ;;  %s842_s11 = scalar_lea.vmem [#allocation8], %s862_s15  ;;  %v83_v18 = vld [vmem:[%s82_s3] sm:$0x1]  ;;  %s87_s6 = scalar_lea.vmem [#allocation8], %s858_s21 }
  0x51   :  { %v863_v15 = vld [vmem:[%s842_s11 + $0x3] sm:$0x1]  ;;  %104 = vst.msk [vmem:[#allocation2 + $0x4] sm:$0x1] %vm84_vm1, %v861_v14  ;;  %s844_s12 = scalar_lea.vmem [#allocation8], %s864_s19  ;;  %s91_s13 = scalar_lea.vmem [#allocation8], %s1303_s22  ;;  %1029 = vmatpush3.bf16.msra.mxu1 %v1329_v17 }
  0x52   :  { %109 = vst.msk [vmem:[#allocation2 + $0x5] sm:$0x1] %vm84_vm1, %v863_v15  ;;  %v865_v16 = vld [vmem:[%s844_s12 + $0x3] sm:$0x1]  ;;  %v88_v19 = vld [vmem:[%s87_s6] sm:$0x1]  ;;  %1030 = vmatprep.subr.bf16.mxu1 %v1201_v4 }
  0x53   :  { %114 = vst.msk [vmem:[#allocation2 + $0x6] sm:$0x1] %vm84_vm1, %v865_v16  ;;  %85 = vst.msk [vmem:[#allocation2] sm:$0x1] %vm84_vm1, %v83_v18  ;;  %v92_v21 = vld [vmem:[%s91_s13] sm:$0x1] }
  0x54   :  { %89 = vst.msk [vmem:[#allocation2 + $0x1] sm:$0x1] %vm84_vm1, %v88_v19  ;;  %93 = vst.msk [vmem:[#allocation2 + $0x2] sm:$0x1] %vm84_vm1, %v92_v21  ;;  %s846_s14 = scalar_lea.vmem [#allocation8], %s1305_s23  ;;  %s848_s16 = scalar_lea.vmem [#allocation8], %s1307_s24  ;;  %976 = vmatmul.mubr.f32.vlgmr.msra.gmra.mrb[0].mxu1 %v1203_v7 }
  0x55   :  { %v869_v23 = vld [vmem:[%s846_s14 + $0x7] sm:$0x1]  ;;  %s850_s17 = scalar_lea.vmem [#allocation8], %s1309_s25  ;;  %1032 = vmatpush3.bf16.msra.mxu1 %v1317_v11  ;;  %986 = vmatprep.mubr.msk.f32.mxu1 %vm1202_vm0, %v1203_v7  ;;  %s852_s5 = scalar_lea.vmem [#allocation8], %s875_s18  ;;  %v649_v14 = vsub.s32 0, %v648_v13 }
  0x56   :  { %v871_v24 = vld [vmem:[%s848_s16 + $0x7] sm:$0x1]  ;;  %272 = vst.msk [vmem:[#allocation2 + $0x8] sm:$0x1] %vm84_vm1, %v869_v23  ;;  %1033 = vmatprep.subr.bf16.mxu1 %v1201_v4  ;;  %v876_v33 = vld [vmem:[%s852_s5 + $0xc] sm:$0x1] }
  0x57   :  { %277 = vst.msk [vmem:[#allocation2 + $0x9] sm:$0x1] %vm84_vm1, %v871_v24  ;;  %v873_v25 = vld [vmem:[%s850_s17 + $0x7] sm:$0x1]  ;;  %s854_s15 = scalar_lea.vmem [#allocation8], %s877_s1  ;;  %s856_s19 = scalar_lea.vmem [#allocation8], %s879_s0  ;;  %v650_v18 = vrot.slane %v540_v52, %v649_v14 }
  0x58   :  { %282 = vst.msk [vmem:[#allocation2 + $0xa] sm:$0x1] %vm84_vm1, %v873_v25  ;;  %v878_v34 = vld [vmem:[%s854_s15 + $0xc] sm:$0x1]  ;;  %367 = vst.msk [vmem:[#allocation2 + $0xc] sm:$0x1] %vm84_vm1, %v876_v33 }
  0x59   :  { %372 = vst.msk [vmem:[#allocation2 + $0xd] sm:$0x1] %vm84_vm1, %v878_v34  ;;  %v880_v35 = vld [vmem:[%s856_s19 + $0xc] sm:$0x1]  ;;  %1035 = vmatpush3.bf16.msra.mxu1 %v1329_v17  ;;  %s1204_s4 = smov 64   ;;  %s1205_s22 = smov 32  }
  0x5a   :  { %v115_v29 = vld [vmem:[#allocation2 + $0x4] sm:$0x7]  ;;  %377 = vst.msk [vmem:[#allocation2 + $0xe] sm:$0x1] %vm84_vm1, %v880_v35  ;;  %1036 = vmatprep.subr.bf16.mxu1 %v1201_v4  ;;  %s1206_s23 = smov 96   ;;  %s1207_s24 = smov [#allocation12]  }
  0x5b   :  { %932 = vmatmul.mubr.msk.f32.vlgmr.msra.gmra.mrb[0].mxu0 %vm120_vm2, %v115_v29  ;;  %v94_v36 = vld [vmem:[#allocation2] sm:$0x7]  ;;  %s826_s25 = sshll.u32 %s1207_s24, 4  ;;  %s827_s25 = int_to_ptr.vmem [resolvable:$true] %s826_s25 }
  0x5c   :  { %1008 = vmatpush3.bf16.msra.mxu0 %v1007_v26  ;;  %942 = vmatprep.mubr.msk.f32.mxu0 %vm1202_vm0, %v1203_v7  ;;  %s1165_s2 = scalar_lea.vmem %s827_s25, 16  ;;  %s1169_s27 = scalar_lea.vmem %s827_s25, 32 }
  0x5d   :  { %1009 = vmatprep.subr.bf16.mxu0 %v1201_v4  ;;  %p1166_p1 = scmp.ne.s32.totalorder %s827_s25, %s1165_s2  ;;  %p1170_p2 = scmp.lt.s32.totalorder %s827_s25, %s827_s25 }
  0x5e   :  { %p1171_p3 = scmp.lt.s32.totalorder %s1169_s27, %s1165_s2 }
  0x5f   :  { %v283_v43 = vld [vmem:[#allocation2 + $0x8] sm:$0x7] }
  0x60   :  { %1011 = vmatpush3.bf16.msra.mxu0 %v1010_v30  ;;  %p1172_p4 = por %p1171_p3, %p1170_p2 }
  0x61   :  { %1012 = vmatprep.subr.bf16.mxu0 %v1201_v4  ;;  %v378_v48 = vld [vmem:[#allocation2 + $0xc] sm:$0x7] }
  0x62   :  { %p1173_p5 = pnand %p1172_p4, %p1166_p1 }
  0x63   :  { %943 = vmatmul.mubr.msk.f32.vlgmr.msra.gmra.mrb[0].mxu0 %vm120_vm2, %v94_v36 }
  0x64   :  { %1014 = vmatpush3.bf16.msra.mxu0 %v1013_v37  ;;  %953 = vmatprep.mubr.msk.f32.mxu0 %vm1202_vm0, %v1203_v7 }
  0x65   :  { %1015 = vmatprep.subr.bf16.mxu0 %v1201_v4 }
  0x68   :  { %1017 = vmatpush3.bf16.msra.mxu0 %v1016_v40 }
  0x69   :  { %1018 = vmatprep.subr.bf16.mxu0 %v1201_v4 }
  0x6b   :  { %954 = vmatmul.mubr.msk.f32.vlgmr.msra.gmra.mrb[0].mxu0 %vm120_vm2, %v283_v43 }
  0x6c   :  { %1020 = vmatpush3.bf16.msra.mxu0 %v1019_v44  ;;  %964 = vmatprep.mubr.msk.f32.mxu0 %vm1202_vm0, %v1203_v7 }
  0x6d   :  { %1021 = vmatprep.subr.bf16.mxu0 %v1201_v4 }
  0x70   :  { %1023 = vmatpush3.bf16.msra.mxu0 %v1022_v47 }
  0x73   :  { %965 = vmatmul.mubr.msk.f32.vlgmr.msra.gmra.mrb[0].mxu0 %vm120_vm2, %v378_v48  ;;  %v887_v48 = vld [vmem:[#allocation11] ss:$0 sm:$0xff] }
 0x127   :  { %v535_v49 = vpop.f32.mrb[0].mxu1 }
 0x128   :  { %v977_v50 = vpop.f32.mrb[1].mxu1 }
 0x146   :  { %v1370_v51 = vpop.f32.mrb[0].mxu0 }
 0x147   :  { %v539_v53 = vadd.f32 %v535_v49, %v1370_v51  ;;  %v966_v54 = vpop.f32.mrb[1].mxu0 }
 0x149   :  { %v541_v55 = vadd.f32 %v540_v52, %v539_v53 }
 0x14b   :  { %v882_v56 = vmul.f32 -1.442695, %v541_v55 }
 0x14d   :  { %1063 = vpow2.f32 %v882_v56 }
 0x14e   :  { %1065 = vtanh.f32 %v541_v55 }
 0x157   :  { %v1064_v57 = vpop.eup %1063 }
 0x158   :  { %v546_v59 = vadd.f32 1.0, %v1064_v57  ;;  %v1066_v62 = vpop.eup %1065 }
 0x15a   :  { %1067 = vrcp.f32 %v546_v59 }
 0x164   :  { %v1068_v63 = vpop.eup %1067 }
 0x165   :  { %v549_v0 = vsel %vm1376_vm5, %v1066_v62, %v1068_v63 }
 0x166   :  { %552 = vrot.lane.b32.xlu0 %v549_v0, %s1204_s4  ;;  %v550_v3 = vmul.f32 0.0, %v549_v0 }
 0x1d8   :  { %v553_v1 = vpop.permute.xlu0 %552 }
 0x1d9   :  { %v555_v2 = vmul.f32 %v553_v1, %v549_v0 }
 0x1db   :  { %557 = vrot.lane.b32.xlu0 %v555_v2, %s1205_s22 }
 0x24d   :  { %v558_v5 = vpop.permute.xlu0 %557 }
 0x24e   :  { %v560_v6 = vadd.f32 %v558_v5, %v550_v3  ;;  %v816_v5 = vld [vmem:[#allocation3] sm:$0x1] }
 0x250   :  { %1069 = vtanh.f32 %v560_v6  ;;  %v662_v26 = vrot.slane %v560_v6, 7 }
 0x25a   :  { %v1070_v8 = vpop.eup %1069 }
 0x25b   :  { %563 = vrot.lane.b32.xlu1 %v1070_v8, %s1204_s4 }
 0x2cd   :  { %v564_v9 = vpop.permute.xlu1 %563 }
 0x2ce   :  { %v566_v10 = vmul.f32 %v564_v9, %v549_v0 }
 0x2d0   :  { %568 = vrot.lane.b32.xlu1 %v566_v10, %s1205_s22 }
 0x342   :  { %v569_v12 = vpop.permute.xlu1 %568 }
 0x343   :  { %987 = vmatmul.mubr.msk.f32.vlgmr.msra.gmra.mrb[2].mxu1 %vm120_vm2, %v569_v12 }
 0x344   :  { %1038 = vmatpush3.bf16.msra.mxu1 %v1317_v11  ;;  %997 = vmatprep.mubr.msk.f32.mxu1 %vm1202_vm0, %v1203_v7 }
 0x345   :  { %1039 = vmatprep.subr.bf16.mxu1 %v1201_v4 }
 0x348   :  { %1041 = vmatpush3.bf16.msra.mxu1 %v1329_v17 }
 0x416   :  { %v638_v15 = vpop.f32.mrb[2].mxu1 }
 0x417   :  { %v643_v16 = vrot.slane %v638_v15, 7  ;;  %v988_v19 = vpop.f32.mrb[3].mxu1 }
 0x419   :  { %v645_v20 = vadd.f32 %v643_v16, %v1370_v51 }
 0x41b   :  { %v652_v21 = vadd.f32 %v650_v18, %v645_v20 }
 0x41d   :  { %v884_v22 = vmul.f32 -1.442695, %v652_v21 }
 0x41f   :  { %1071 = vpow2.f32 %v884_v22 }
 0x420   :  { %1073 = vtanh.f32 %v652_v21 }
 0x429   :  { %v1072_v23 = vpop.eup %1071 }
 0x42a   :  { %v657_v11 = vadd.f32 1.0, %v1072_v23  ;;  %v1074_v7 = vpop.eup %1073 }
 0x42c   :  { %1075 = vrcp.f32 %v657_v11 }
 0x436   :  { %v1076_v24 = vpop.eup %1075 }
 0x437   :  { %v660_v4 = vsel %vm1376_vm5, %v1074_v7, %v1076_v24 }
 0x438   :  { %666 = vrot.lane.b32.xlu0 %v660_v4, %s1204_s4  ;;  %v664_v27 = vmul.f32 %v662_v26, %v660_v4 }
 0x4aa   :  { %v667_v17 = vpop.permute.xlu0 %666 }
 0x4ab   :  { %v669_v25 = vmul.f32 %v667_v17, %v660_v4 }
 0x4ad   :  { %671 = vrot.lane.b32.xlu1 %v669_v25, %s1205_s22 }
 0x51f   :  { %v672_v28 = vpop.permute.xlu1 %671 }
 0x520   :  { %v674_v29 = vadd.f32 %v672_v28, %v664_v27 }
 0x522   :  { %1077 = vtanh.f32 %v674_v29  ;;  %v771_v49 = vrot.slane %v674_v29, 7 }
 0x52c   :  { %v1078_v30 = vpop.eup %1077 }
 0x52d   :  { %677 = vrot.lane.b32.xlu0 %v1078_v30, %s1204_s4 }
 0x59f   :  { %v678_v31 = vpop.permute.xlu0 %677 }
 0x5a0   :  { %v680_v32 = vmul.f32 %v678_v31, %v660_v4 }
 0x5a2   :  { %v682_v33 = vrot.slane %v680_v32, 1 }
 0x5a4   :  { %683 = vrot.lane.b32.xlu1 %v682_v33, %s1205_s22 }
 0x616   :  { %v684_v34 = vpop.permute.xlu1 %683 }
 0x617   :  { %998 = vmatmul.mubr.msk.f32.vlgmr.msra.gmra.mrb[4].mxu1 %vm120_vm2, %v684_v34 }
 0x6ea   :  { %v753_v35 = vpop.f32.mrb[4].mxu1 }
 0x6eb   :  { %v758_v36 = vrot.slane %v753_v35, 6  ;;  %v999_v37 = vpop.f32.mrb[5].mxu1 }
 0x6ed   :  { %v760_v38 = vadd.f32 %v758_v36, %v1370_v51 }
 0x6ef   :  { %v761_v39 = vadd.f32 %v760_v38, %v650_v18 }
 0x6f1   :  { %v886_v40 = vmul.f32 -1.442695, %v761_v39 }
 0x6f3   :  { %1079 = vpow2.f32 %v886_v40 }
 0x6f4   :  { %1081 = vtanh.f32 %v761_v39 }
 0x6fd   :  { %v1080_v41 = vpop.eup %1079 }
 0x6fe   :  { %v766_v42 = vadd.f32 1.0, %v1080_v41  ;;  %v1082_v43 = vpop.eup %1081 }
 0x700   :  { %1083 = vrcp.f32 %v766_v42 }
 0x70a   :  { %v1084_v44 = vpop.eup %1083 }
 0x70b   :  { %v769_v45 = vsel %vm1376_vm5, %v1082_v43, %v1084_v44 }
 0x70c   :  { %775 = vrot.lane.b32.xlu0 %v769_v45, %s1204_s4  ;;  %v773_v50 = vmul.f32 %v771_v49, %v769_v45 }
 0x77e   :  { %v776_v46 = vpop.permute.xlu0 %775 }
 0x77f   :  { %v778_v47 = vmul.f32 %v776_v46, %v769_v45 }
 0x781   :  { %780 = vrot.lane.b32.xlu1 %v778_v47, %s1205_s22 }
 0x785   :  { %796 = vrot.lane.b32.xlu1 %v887_v48, %s1206_s23 }
 0x7f3   :  { %v781_v51 = vpop.permute.xlu1 %780 }
 0x7f4   :  { %v783_v52 = vadd.f32 %v781_v51, %v773_v50 }
 0x7f6   :  { %1085 = vtanh.f32 %v783_v52 }
 0x7f7   :  { %v797_v55 = vpop.permute.xlu1 %796 }
 0x800   :  { %v1086_v53 = vpop.eup %1085 }
 0x801   :  { %786 = vrot.lane.b32.xlu0 %v1086_v53, %s1204_s4 }
 0x873   :  { %v787_v54 = vpop.permute.xlu0 %786 }
 0x874   :  { %v789_v56 = vmul.f32 %v787_v54, %v769_v45 }
 0x876   :  { %v799_v57 = vmul.f32 %v797_v55, %v789_v56 }
 0x878   :  { %v801_v58 = vrot.slane %v799_v57, 2 }
 0x87a   :  { %802 = vrot.lane.b32.xlu0 %v801_v58, %s1205_s22 }
 0x8ec   :  { %v803_v59 = vpop.permute.xlu0 %802 }
 0x8ed   :  { %v805_v60 = vsel %vm84_vm1, %v803_v59, 0.0 }
 0x8ee   :  { %806 = vadd.xlane.f32.xlu1 %v805_v60 }
 0x97b   :  { %v807_v61 = vpop.xlane.xlu1 %806 }
 0x97c   :  { %v808_v62 = vrot.slane %v807_v61, 4 }
 0x97e   :  { %v809_v63 = vadd.f32 %v808_v62, %v807_v61 }
 0x980   :  { %v810_v0 = vrot.slane %v809_v63, 2 }
 0x982   :  { %v811_v1 = vadd.f32 %v810_v0, %v809_v63 }
 0x984   :  { %v812_v2 = vrot.slane %v811_v1, 1 }
 0x986   :  { %v813_v3 = vadd.f32 %v812_v2, %v811_v1 }
 0x988   :  { %1048 = vpush %v813_v3 }
 0x9b9   :  { %s1049_s26 = spop %1048 }
 0x9ba   :  { %v815_v6 = vstv %s1049_s26 }
 0x9bb   :  { %v817_v8 = vadd.f32 %v816_v5, %v815_v6 }
 0x9bd   :  { %819 = vst.msk [vmem:[#allocation12] sm:$0x1] %vm818_vm6, %v817_v8 }
 0x9be   :  { %1176 = shalt.err (!%p1173_p5)
}
 0x9bf   :  { %s1177_s28 = scalar_lea.hbm %s1427_s7, 16 }
 0x9c0   :  { %p1178_p6 = scmp.ne.s32.totalorder %s1427_s7, %s1177_s28  ;;  %p1181_p7 = scmp.lt.u32.totalorder %s1177_s28, %s1427_s7 }
 0x9c2   :  { %p1183_p8 = pnand %p1181_p7, %p1178_p6 }
 0x9c4   :  { %1186 = shalt.err (!%p1183_p8)
}
 0x9c5   :  { %829 = dma.vmem_to_hbm [thread:$0]  %s827_s25, 16, %s1427_s7, [#allocation6]  }
 0x9c6   :  { %1193 = dma.done.wait [#allocation6], 16  }
 0x9c7   :  { %1194 = vsyncadd [#allocation6], 4294967280 }
 0x9c8   :  { %833 = vsyncpa [#allocation5], 1 }
 0x9c9   :  { %834 = vsyncpa [#allocation10], 1 }
 0x9ca   :  { %835 = vsyncpa [#allocation6], 1 }
 0x9cb   :  { %836 = vsyncpa [#allocation7], 1 }

</bundles_post_ra>
